<compile_context>
chip_gen: v7x
topology: tpu7x:2x2x1
jax: 0.10.0
libtpu: 0.0.40
codegen_flags: <defaults>
</compile_context>

<pallas_src>
import jax
import jax.numpy as jnp
from jax.experimental import pallas as pl
from jax.experimental.pallas import tpu as pltpu


def _round_up(n, m=128):
    return ((n + m - 1) // m) * m


def _causal_conv(x, w_ref, b_ref, K, dilation):
    """x: (L, Cin_p) bf16, w_ref: (K*Cin_p, Cout_p) bf16, b_ref: (1, Cout_p) f32.

    Returns f32 (L, Cout_p). Causal (Chomp1d) semantics via a left-zero-padded
    copy of x and K static shifted views concatenated along the lane axis.
    """
    L, C = x.shape
    pad = (K - 1) * dilation
    if pad > 0:
        xp = jnp.concatenate([jnp.zeros((pad, C), x.dtype), x], axis=0)
    else:
        xp = x
    taps = [xp[k * dilation: k * dilation + L, :] for k in range(K)]
    xi = taps[0] if K == 1 else jnp.concatenate(taps, axis=1)   # (L, K*Cin_p)
    return jnp.dot(xi, w_ref[...], preferred_element_type=jnp.float32) + b_ref[...]


def _make_tcn_kernel(metas, emit_all_layers):
    """metas: list of {"K": int, "d": int, "has_ds": bool} per layer."""

    def kernel(*refs):
        x_ref = refs[0]
        pos = 1
        h = x_ref[0]                                   # (L, Cp0) bf16
        layer_outs = []
        for m in metas:
            w1, b1, w2, b2 = refs[pos:pos + 4]
            pos += 4
            if m["has_ds"]:
                wd, bd = refs[pos:pos + 2]
                pos += 2
            hin = h                                    # layer input, bf16
            h1 = jnp.maximum(_causal_conv(hin, w1, b1, m["K"], m["d"]), 0.0)
            h1 = h1.astype(jnp.bfloat16)
            h2 = jnp.maximum(_causal_conv(h1, w2, b2, m["K"], m["d"]), 0.0)
            if m["has_ds"]:
                res = jnp.dot(hin, wd[...],
                              preferred_element_type=jnp.float32) + bd[...]
            else:
                res = hin.astype(jnp.float32)
            h = jnp.maximum(h2 + res, 0.0).astype(jnp.bfloat16)
            layer_outs.append(h)

        out_refs = refs[pos:]
        if emit_all_layers:
            for o_ref, y in zip(out_refs, layer_outs):
                o_ref[0] = y
        else:
            out_refs[0][0] = layer_outs[-1]

    return kernel


def temporal_conv_net(x_ncl, params, kernel_size, concat_layers=False):
    """Forward of TemporalConvNet.  x_ncl: (B, C_in, L), PyTorch layout."""
    B, Cin, L = x_ncl.shape
    K = kernel_size

    # NCL -> NLC, zero-pad channels to a lane-dense multiple of 128, cast bf16.
    cp0 = _round_up(Cin)
    x = jnp.transpose(x_ncl, (0, 2, 1)).astype(jnp.float32)
    x = jnp.pad(x, ((0, 0), (0, 0), (0, cp0 - Cin))).astype(jnp.bfloat16)

    metas, prepared, real_couts, pad_couts = [], [], [], []
    cin = Cin
    for i, p in enumerate(params):
        cout = p["w1"].shape[2]
        cin_p, cout_p = _round_up(cin), _round_up(cout)
        has_ds = "wd" in p
        lp = {
            # im2col weight layout: (K, Cin_p, Cout_p) -> (K*Cin_p, Cout_p)
            "w1": jnp.pad(p["w1"], ((0, 0), (0, cin_p - cin), (0, cout_p - cout))
                          ).reshape(K * cin_p, cout_p).astype(jnp.bfloat16),
            "b1": jnp.pad(p["b1"], ((0, 0), (0, cout_p - cout))),
            "w2": jnp.pad(p["w2"], ((0, 0), (0, cout_p - cout), (0, cout_p - cout))
                          ).reshape(K * cout_p, cout_p).astype(jnp.bfloat16),
            "b2": jnp.pad(p["b2"], ((0, 0), (0, cout_p - cout))),
        }
        if has_ds:
            lp["wd"] = jnp.pad(p["wd"], ((0, cin_p - cin), (0, cout_p - cout))
                               ).astype(jnp.bfloat16)
            lp["bd"] = jnp.pad(p["bd"], ((0, 0), (0, cout_p - cout)))
        metas.append({"K": K, "d": 2 ** i, "has_ds": has_ds})
        prepared.append(lp)
        real_couts.append(cout)
        pad_couts.append(cout_p)
        cin = cout

    def _full_spec(shape):
        n = len(shape)
        return pl.BlockSpec(shape, lambda b, _n=n: (0,) * _n)

    in_specs = [pl.BlockSpec((1, L, cp0), lambda b: (b, 0, 0))]
    args = [x]
    for lp in prepared:
        for name in ("w1", "b1", "w2", "b2", "wd", "bd"):
            if name in lp:
                in_specs.append(_full_spec(lp[name].shape))
                args.append(lp[name])

    if concat_layers:
        out_shape = tuple(jax.ShapeDtypeStruct((B, L, cp), jnp.bfloat16)
                          for cp in pad_couts)
        out_specs = [pl.BlockSpec((1, L, cp), lambda b: (b, 0, 0))
                     for cp in pad_couts]
    else:
        out_shape = jax.ShapeDtypeStruct((B, L, pad_couts[-1]), jnp.bfloat16)
        out_specs = pl.BlockSpec((1, L, pad_couts[-1]), lambda b: (b, 0, 0))

    kernel = _make_tcn_kernel(metas, emit_all_layers=concat_layers)

    outs = pl.pallas_call(
        kernel,
        out_shape=out_shape,
        grid_spec=pltpu.PrefetchScalarGridSpec(
            num_scalar_prefetch=0,
            grid=(B,),
            in_specs=in_specs,
            out_specs=out_specs,
        ),
        compiler_params=pltpu.CompilerParams(dimension_semantics=("parallel",)),
    )(*args)

    if concat_layers:
        parts = [o[:, :, :c] for o, c in zip(outs, real_couts)]
        out = jnp.concatenate(parts, axis=-1)
    else:
        out = outs[:, :, :real_couts[-1]]
    return jnp.transpose(out, (0, 2, 1)).astype(jnp.float32)   # back to (B, C, L)


def init_tcn_params(key, num_inputs, num_channels, kernel_size):
    """Deterministic synthetic parameters mirroring TemporalBlock.__init__."""
    params = []
    for i, cout in enumerate(num_channels):
        cin = num_inputs if i == 0 else num_channels[i - 1]
        key, k1, k2, k3, k4, k5, k6 = jax.random.split(key, 7)
        # Conv1d weights (Cout, Cin, K), init ~ N(0, 0.01) (init_weights);
        # weight_norm is identity at init so effective weight == v.
        w1 = 0.01 * jax.random.normal(k1, (cout, cin, kernel_size), jnp.float32)
        w2 = 0.01 * jax.random.normal(k2, (cout, cout, kernel_size), jnp.float32)
        b1 = 0.01 * jax.random.normal(k3, (cout,), jnp.float32)
        b2 = 0.01 * jax.random.normal(k4, (cout,), jnp.float32)
        p = {
            "w1": jnp.transpose(w1, (2, 1, 0)),   # (K, Cin, Cout)
            "b1": b1.reshape(1, cout),
            "w2": jnp.transpose(w2, (2, 1, 0)),   # (K, Cout, Cout)
            "b2": b2.reshape(1, cout),
        }
        if cin != cout:
            wd = 0.01 * jax.random.normal(k5, (cout, cin, 1), jnp.float32)
            bd = 0.01 * jax.random.normal(k6, (cout,), jnp.float32)
            p["wd"] = jnp.transpose(wd[:, :, 0], (1, 0))  # (Cin, Cout)
            p["bd"] = bd.reshape(1, cout)
        params.append(p)
    return params


# ---------------- pure-JAX f32 reference (for correctness check) ----------------
def _ref_block(x, p, K, d):
    B, L, _ = x.shape

    def conv(inp, w, b):
        out = jnp.zeros((B, L, w.shape[2]), jnp.float32) + b
        for k in range(K):
            s = (K - 1 - k) * d
            shifted = jnp.pad(inp, ((0, 0), (s, 0), (0, 0)))[:, :L, :]
            out = out + jnp.einsum("blc,cd->bld", shifted, w[k])
        return out

    h1 = jnp.maximum(conv(x, p["w1"], p["b1"]), 0.0)
    h2 = jnp.maximum(conv(h1, p["w2"], p["b2"]), 0.0)
    if "wd" in p:
        res = jnp.einsum("blc,cd->bld", x, p["wd"]) + p["bd"]
    else:
        res = x
    return jnp.maximum(h2 + res, 0.0)


def _ref_tcn(x_ncl, params, K):
    x = jnp.transpose(x_ncl, (0, 2, 1)).astype(jnp.float32)
    for i, p in enumerate(params):
        x = _ref_block(x, p, K, 2 ** i)
    return jnp.transpose(x, (0, 2, 1))


if __name__ == "__main__":
    B, L = 2, 16
    num_inputs = 4
    num_channels = [8, 8]
    kernel_size = 2

    key = jax.random.PRNGKey(0)
    kx, kp = jax.random.split(key)
    x = jax.random.normal(kx, (B, num_inputs, L), jnp.float32)  # PyTorch (N, C, L)
    params = init_tcn_params(kp, num_inputs, num_channels, kernel_size)

    out = temporal_conv_net(x, params, kernel_size)
    out = jax.block_until_ready(out)

    assert out.shape == (B, num_channels[-1], L), out.shape
    ref = _ref_tcn(x, params, kernel_size)
    # bf16 matmuls / bf16 activation storage vs. an f32 reference: allow
    # bf16-level tolerance (errors here are << 1e-3 at these magnitudes).
    max_err = float(jnp.max(jnp.abs(out - ref)))
    assert jnp.allclose(out, ref, atol=1e-2, rtol=1e-2), max_err

    print("KERNEL_OK")
</pallas_src>

<mosaic_0001>
module attributes {stable_mosaic.version = 11 : i64} {
  func.func @kernel(%arg0: i32, %arg1: memref<1x16x128xbf16, #tpu.memory_space<vmem>>, %arg2: memref<256x128xbf16, #tpu.memory_space<vmem>>, %arg3: memref<1x128xf32, #tpu.memory_space<vmem>>, %arg4: memref<256x128xbf16, #tpu.memory_space<vmem>>, %arg5: memref<1x128xf32, #tpu.memory_space<vmem>>, %arg6: memref<128x128xbf16, #tpu.memory_space<vmem>>, %arg7: memref<1x128xf32, #tpu.memory_space<vmem>>, %arg8: memref<256x128xbf16, #tpu.memory_space<vmem>>, %arg9: memref<1x128xf32, #tpu.memory_space<vmem>>, %arg10: memref<256x128xbf16, #tpu.memory_space<vmem>>, %arg11: memref<1x128xf32, #tpu.memory_space<vmem>>, %arg12: memref<1x16x128xbf16, #tpu.memory_space<vmem>>) attributes {dimension_semantics = [#tpu.dimension_semantics<parallel>], iteration_bounds = array<i64: 2>, scalar_prefetch = 0 : i64, scratch_operands = 0 : i64, tpu.core_type = #tpu.core_type<tc>, window_params = [{transform_indices = @transform_0, window_bounds = array<i64: 1, 16, 128>}, {pipeline_mode = #tpu.pipeline_mode<synchronous>, transform_indices = @transform_1, window_bounds = array<i64: 256, 128>}, {pipeline_mode = #tpu.pipeline_mode<synchronous>, transform_indices = @transform_2, window_bounds = array<i64: 1, 128>}, {pipeline_mode = #tpu.pipeline_mode<synchronous>, transform_indices = @transform_3, window_bounds = array<i64: 256, 128>}, {pipeline_mode = #tpu.pipeline_mode<synchronous>, transform_indices = @transform_4, window_bounds = array<i64: 1, 128>}, {pipeline_mode = #tpu.pipeline_mode<synchronous>, transform_indices = @transform_5, window_bounds = array<i64: 128, 128>}, {pipeline_mode = #tpu.pipeline_mode<synchronous>, transform_indices = @transform_6, window_bounds = array<i64: 1, 128>}, {pipeline_mode = #tpu.pipeline_mode<synchronous>, transform_indices = @transform_7, window_bounds = array<i64: 256, 128>}, {pipeline_mode = #tpu.pipeline_mode<synchronous>, transform_indices = @transform_8, window_bounds = array<i64: 1, 128>}, {pipeline_mode = #tpu.pipeline_mode<synchronous>, transform_indices = @transform_9, window_bounds = array<i64: 256, 128>}, {pipeline_mode = #tpu.pipeline_mode<synchronous>, transform_indices = @transform_10, window_bounds = array<i64: 1, 128>}, {transform_indices = @transform_11, window_bounds = array<i64: 1, 16, 128>}]} {
    %c0 = arith.constant 0 : index
    %c0_0 = arith.constant 0 : index
    %c0_1 = arith.constant 0 : index
    %0 = vector.load %arg1[%c0, %c0_0, %c0_1] : memref<1x16x128xbf16, #tpu.memory_space<vmem>>, vector<1x16x128xbf16>
    %1 = vector.shape_cast %0 : vector<1x16x128xbf16> to vector<16x128xbf16>
    %cst = arith.constant 0.000000e+00 : bf16
    %2 = vector.broadcast %cst : bf16 to vector<1x128xbf16>
    %3 = tpu.concatenate %2, %1 in 0 : vector<1x128xbf16>, vector<16x128xbf16> -> vector<17x128xbf16>
    %4 = vector.extract_strided_slice %3 {offsets = [0, 0], sizes = [16, 128], strides = [1, 1]} : vector<17x128xbf16> to vector<16x128xbf16>
    %5 = vector.extract_strided_slice %3 {offsets = [1, 0], sizes = [16, 128], strides = [1, 1]} : vector<17x128xbf16> to vector<16x128xbf16>
    %6 = tpu.concatenate %4, %5 in 1 : vector<16x128xbf16>, vector<16x128xbf16> -> vector<16x256xbf16>
    %c0_2 = arith.constant 0 : index
    %c0_3 = arith.constant 0 : index
    %7 = vector.load %arg2[%c0_2, %c0_3] : memref<256x128xbf16, #tpu.memory_space<vmem>>, vector<256x128xbf16>
    %cst_4 = arith.constant dense<0.000000e+00> : vector<16x128xf32>
    %8 = tpu.matmul %6, %7, %cst_4 {dimension_numbers = #tpu.dot_dimension_numbers<[1], [0], [0], [1], [0, 0, 1, 1], [], []>} : vector<16x256xbf16>, vector<256x128xbf16>, vector<16x128xf32> -> vector<16x128xf32>
    %c0_5 = arith.constant 0 : index
    %c0_6 = arith.constant 0 : index
    %9 = vector.load %arg3[%c0_5, %c0_6] : memref<1x128xf32, #tpu.memory_space<vmem>>, vector<1x128xf32>
    %10 = vector.broadcast %9 : vector<1x128xf32> to vector<16x128xf32>
    %11 = arith.addf %8, %10 : vector<16x128xf32>
    %cst_7 = arith.constant 0.000000e+00 : f32
    %12 = vector.broadcast %cst_7 : f32 to vector<16x128xf32>
    %13 = arith.maximumf %11, %12 : vector<16x128xf32>
    %14 = arith.truncf %13 : vector<16x128xf32> to vector<16x128xbf16>
    %cst_8 = arith.constant 0.000000e+00 : bf16
    %15 = vector.broadcast %cst_8 : bf16 to vector<1x128xbf16>
    %16 = tpu.concatenate %15, %14 in 0 : vector<1x128xbf16>, vector<16x128xbf16> -> vector<17x128xbf16>
    %17 = vector.extract_strided_slice %16 {offsets = [0, 0], sizes = [16, 128], strides = [1, 1]} : vector<17x128xbf16> to vector<16x128xbf16>
    %18 = vector.extract_strided_slice %16 {offsets = [1, 0], sizes = [16, 128], strides = [1, 1]} : vector<17x128xbf16> to vector<16x128xbf16>
    %19 = tpu.concatenate %17, %18 in 1 : vector<16x128xbf16>, vector<16x128xbf16> -> vector<16x256xbf16>
    %c0_9 = arith.constant 0 : index
    %c0_10 = arith.constant 0 : index
    %20 = vector.load %arg4[%c0_9, %c0_10] : memref<256x128xbf16, #tpu.memory_space<vmem>>, vector<256x128xbf16>
    %cst_11 = arith.constant dense<0.000000e+00> : vector<16x128xf32>
    %21 = tpu.matmul %19, %20, %cst_11 {dimension_numbers = #tpu.dot_dimension_numbers<[1], [0], [0], [1], [0, 0, 1, 1], [], []>} : vector<16x256xbf16>, vector<256x128xbf16>, vector<16x128xf32> -> vector<16x128xf32>
    %c0_12 = arith.constant 0 : index
    %c0_13 = arith.constant 0 : index
    %22 = vector.load %arg5[%c0_12, %c0_13] : memref<1x128xf32, #tpu.memory_space<vmem>>, vector<1x128xf32>
    %23 = vector.broadcast %22 : vector<1x128xf32> to vector<16x128xf32>
    %24 = arith.addf %21, %23 : vector<16x128xf32>
    %cst_14 = arith.constant 0.000000e+00 : f32
    %25 = vector.broadcast %cst_14 : f32 to vector<16x128xf32>
    %26 = arith.maximumf %24, %25 : vector<16x128xf32>
    %c0_15 = arith.constant 0 : index
    %c0_16 = arith.constant 0 : index
    %27 = vector.load %arg6[%c0_15, %c0_16] : memref<128x128xbf16, #tpu.memory_space<vmem>>, vector<128x128xbf16>
    %cst_17 = arith.constant dense<0.000000e+00> : vector<16x128xf32>
    %28 = tpu.matmul %1, %27, %cst_17 {dimension_numbers = #tpu.dot_dimension_numbers<[1], [0], [0], [1], [0, 0, 1, 1], [], []>} : vector<16x128xbf16>, vector<128x128xbf16>, vector<16x128xf32> -> vector<16x128xf32>
    %c0_18 = arith.constant 0 : index
    %c0_19 = arith.constant 0 : index
    %29 = vector.load %arg7[%c0_18, %c0_19] : memref<1x128xf32, #tpu.memory_space<vmem>>, vector<1x128xf32>
    %30 = vector.broadcast %29 : vector<1x128xf32> to vector<16x128xf32>
    %31 = arith.addf %28, %30 : vector<16x128xf32>
    %32 = arith.addf %26, %31 : vector<16x128xf32>
    %cst_20 = arith.constant 0.000000e+00 : f32
    %33 = vector.broadcast %cst_20 : f32 to vector<16x128xf32>
    %34 = arith.maximumf %32, %33 : vector<16x128xf32>
    %35 = arith.truncf %34 : vector<16x128xf32> to vector<16x128xbf16>
    %cst_21 = arith.constant 0.000000e+00 : bf16
    %36 = vector.broadcast %cst_21 : bf16 to vector<2x128xbf16>
    %37 = tpu.concatenate %36, %35 in 0 : vector<2x128xbf16>, vector<16x128xbf16> -> vector<18x128xbf16>
    %38 = vector.extract_strided_slice %37 {offsets = [0, 0], sizes = [16, 128], strides = [1, 1]} : vector<18x128xbf16> to vector<16x128xbf16>
    %39 = vector.extract_strided_slice %37 {offsets = [2, 0], sizes = [16, 128], strides = [1, 1]} : vector<18x128xbf16> to vector<16x128xbf16>
    %40 = tpu.concatenate %38, %39 in 1 : vector<16x128xbf16>, vector<16x128xbf16> -> vector<16x256xbf16>
    %c0_22 = arith.constant 0 : index
    %c0_23 = arith.constant 0 : index
    %41 = vector.load %arg8[%c0_22, %c0_23] : memref<256x128xbf16, #tpu.memory_space<vmem>>, vector<256x128xbf16>
    %cst_24 = arith.constant dense<0.000000e+00> : vector<16x128xf32>
    %42 = tpu.matmul %40, %41, %cst_24 {dimension_numbers = #tpu.dot_dimension_numbers<[1], [0], [0], [1], [0, 0, 1, 1], [], []>} : vector<16x256xbf16>, vector<256x128xbf16>, vector<16x128xf32> -> vector<16x128xf32>
    %c0_25 = arith.constant 0 : index
    %c0_26 = arith.constant 0 : index
    %43 = vector.load %arg9[%c0_25, %c0_26] : memref<1x128xf32, #tpu.memory_space<vmem>>, vector<1x128xf32>
    %44 = vector.broadcast %43 : vector<1x128xf32> to vector<16x128xf32>
    %45 = arith.addf %42, %44 : vector<16x128xf32>
    %cst_27 = arith.constant 0.000000e+00 : f32
    %46 = vector.broadcast %cst_27 : f32 to vector<16x128xf32>
    %47 = arith.maximumf %45, %46 : vector<16x128xf32>
    %48 = arith.truncf %47 : vector<16x128xf32> to vector<16x128xbf16>
    %cst_28 = arith.constant 0.000000e+00 : bf16
    %49 = vector.broadcast %cst_28 : bf16 to vector<2x128xbf16>
    %50 = tpu.concatenate %49, %48 in 0 : vector<2x128xbf16>, vector<16x128xbf16> -> vector<18x128xbf16>
    %51 = vector.extract_strided_slice %50 {offsets = [0, 0], sizes = [16, 128], strides = [1, 1]} : vector<18x128xbf16> to vector<16x128xbf16>
    %52 = vector.extract_strided_slice %50 {offsets = [2, 0], sizes = [16, 128], strides = [1, 1]} : vector<18x128xbf16> to vector<16x128xbf16>
    %53 = tpu.concatenate %51, %52 in 1 : vector<16x128xbf16>, vector<16x128xbf16> -> vector<16x256xbf16>
    %c0_29 = arith.constant 0 : index
    %c0_30 = arith.constant 0 : index
    %54 = vector.load %arg10[%c0_29, %c0_30] : memref<256x128xbf16, #tpu.memory_space<vmem>>, vector<256x128xbf16>
    %cst_31 = arith.constant dense<0.000000e+00> : vector<16x128xf32>
    %55 = tpu.matmul %53, %54, %cst_31 {dimension_numbers = #tpu.dot_dimension_numbers<[1], [0], [0], [1], [0, 0, 1, 1], [], []>} : vector<16x256xbf16>, vector<256x128xbf16>, vector<16x128xf32> -> vector<16x128xf32>
    %c0_32 = arith.constant 0 : index
    %c0_33 = arith.constant 0 : index
    %56 = vector.load %arg11[%c0_32, %c0_33] : memref<1x128xf32, #tpu.memory_space<vmem>>, vector<1x128xf32>
    %57 = vector.broadcast %56 : vector<1x128xf32> to vector<16x128xf32>
    %58 = arith.addf %55, %57 : vector<16x128xf32>
    %cst_34 = arith.constant 0.000000e+00 : f32
    %59 = vector.broadcast %cst_34 : f32 to vector<16x128xf32>
    %60 = arith.maximumf %58, %59 : vector<16x128xf32>
    %61 = arith.extf %35 : vector<16x128xbf16> to vector<16x128xf32>
    %62 = arith.addf %60, %61 : vector<16x128xf32>
    %cst_35 = arith.constant 0.000000e+00 : f32
    %63 = vector.broadcast %cst_35 : f32 to vector<16x128xf32>
    %64 = arith.maximumf %62, %63 : vector<16x128xf32>
    %65 = arith.truncf %64 : vector<16x128xf32> to vector<16x128xbf16>
    %c0_36 = arith.constant 0 : index
    %c0_37 = arith.constant 0 : index
    %c0_38 = arith.constant 0 : index
    %66 = vector.load %arg12[%c0_36, %c0_37, %c0_38] : memref<1x16x128xbf16, #tpu.memory_space<vmem>>, vector<1x16x128xbf16>
    %67 = vector.shape_cast %66 : vector<1x16x128xbf16> to vector<16x128xbf16>
    %68 = vector.shape_cast %65 : vector<16x128xbf16> to vector<1x16x128xbf16>
    tpu.vector_store %arg12[%c0_36, %c0_37, %c0_38], %68 {strides = array<i32>} : memref<1x16x128xbf16, #tpu.memory_space<vmem>>, vector<1x16x128xbf16>,
    return
  }
  func.func @transform_0(%arg0: i32) -> (i32, i32, i32) {
    %c0_i32 = arith.constant 0 : i32
    %c0_i32_0 = arith.constant 0 : i32
    %c0_i32_1 = arith.constant 0 : i32
    return %arg0, %c0_i32, %c0_i32_0 : i32, i32, i32
  }
  func.func @transform_1(%arg0: i32) -> (i32, i32) {
    %c0_i32 = arith.constant 0 : i32
    %c0_i32_0 = arith.constant 0 : i32
    %c0_i32_1 = arith.constant 0 : i32
    return %c0_i32, %c0_i32_0 : i32, i32
  }
  func.func @transform_2(%arg0: i32) -> (i32, i32) {
    %c0_i32 = arith.constant 0 : i32
    %c0_i32_0 = arith.constant 0 : i32
    %c0_i32_1 = arith.constant 0 : i32
    return %c0_i32, %c0_i32_0 : i32, i32
  }
  func.func @transform_3(%arg0: i32) -> (i32, i32) {
    %c0_i32 = arith.constant 0 : i32
    %c0_i32_0 = arith.constant 0 : i32
    %c0_i32_1 = arith.constant 0 : i32
    return %c0_i32, %c0_i32_0 : i32, i32
  }
  func.func @transform_4(%arg0: i32) -> (i32, i32) {
    %c0_i32 = arith.constant 0 : i32
    %c0_i32_0 = arith.constant 0 : i32
    %c0_i32_1 = arith.constant 0 : i32
    return %c0_i32, %c0_i32_0 : i32, i32
  }
  func.func @transform_5(%arg0: i32) -> (i32, i32) {
    %c0_i32 = arith.constant 0 : i32
    %c0_i32_0 = arith.constant 0 : i32
    %c0_i32_1 = arith.constant 0 : i32
    return %c0_i32, %c0_i32_0 : i32, i32
  }
  func.func @transform_6(%arg0: i32) -> (i32, i32) {
    %c0_i32 = arith.constant 0 : i32
    %c0_i32_0 = arith.constant 0 : i32
    %c0_i32_1 = arith.constant 0 : i32
    return %c0_i32, %c0_i32_0 : i32, i32
  }
  func.func @transform_7(%arg0: i32) -> (i32, i32) {
    %c0_i32 = arith.constant 0 : i32
    %c0_i32_0 = arith.constant 0 : i32
    %c0_i32_1 = arith.constant 0 : i32
    return %c0_i32, %c0_i32_0 : i32, i32
  }
  func.func @transform_8(%arg0: i32) -> (i32, i32) {
    %c0_i32 = arith.constant 0 : i32
    %c0_i32_0 = arith.constant 0 : i32
    %c0_i32_1 = arith.constant 0 : i32
    return %c0_i32, %c0_i32_0 : i32, i32
  }
  func.func @transform_9(%arg0: i32) -> (i32, i32) {
    %c0_i32 = arith.constant 0 : i32
    %c0_i32_0 = arith.constant 0 : i32
    %c0_i32_1 = arith.constant 0 : i32
    return %c0_i32, %c0_i32_0 : i32, i32
  }
  func.func @transform_10(%arg0: i32) -> (i32, i32) {
    %c0_i32 = arith.constant 0 : i32
    %c0_i32_0 = arith.constant 0 : i32
    %c0_i32_1 = arith.constant 0 : i32
    return %c0_i32, %c0_i32_0 : i32, i32
  }
  func.func @transform_11(%arg0: i32) -> (i32, i32, i32) {
    %c0_i32 = arith.constant 0 : i32
    %c0_i32_0 = arith.constant 0 : i32
    %c0_i32_1 = arith.constant 0 : i32
    return %arg0, %c0_i32, %c0_i32_0 : i32, i32, i32
  }
}

</mosaic_0001>

<bundles_post_ra>
// kernel: tpu_custom_call.1
= control target key start
LH: loop header
LB: loop body
LE: loop exit
PB: predicated region body
PF: predicated region fallthrough
CT: control target
= control target key end

     0   :  { %s2643_s0 = inlined_call_operand.hbm [shape: bf16[2,16,128], index: 0, kind: input, shape index: {}]   ;;  %s2644_s1 = inlined_call_operand.hbm [shape: bf16[256,128], index: 1, kind: input, shape index: {}]   ;;  %s2645_s2 = inlined_call_operand.vmem [shape: f32[1,128], index: 2, kind: input, shape index: {}]   ;;  %s2646_s3 = inlined_call_operand.hbm [shape: bf16[256,128], index: 3, kind: input, shape index: {}]   ;;  %s2647_s4 = inlined_call_operand.vmem [shape: f32[1,128], index: 4, kind: input, shape index: {}]   ;;  %s2648_s5 = inlined_call_operand.hbm [shape: bf16[128,128], index: 5, kind: input, shape index: {}]   ;;  %s2649_s6 = inlined_call_operand.vmem [shape: f32[1,128], index: 6, kind: input, shape index: {}]   ;;  %s2650_s7 = inlined_call_operand.hbm [shape: bf16[256,128], index: 7, kind: input, shape index: {}]   ;;  %s2651_s8 = inlined_call_operand.vmem [shape: f32[1,128], index: 8, kind: input, shape index: {}]   ;;  %s2652_s9 = inlined_call_operand.hbm [shape: bf16[256,128], index: 9, kind: input, shape index: {}]   ;;  %s2653_s10 = inlined_call_operand.vmem [shape: f32[1,128], index: 10, kind: input, shape index: {}]   ;;  %s2654_s11 = inlined_call_operand.hbm [shape: bf16[2,16,128], index: 11, kind: output, shape index: {}]  }
   0x1   :  { %2660 = sst [smem:[#allocation19_spill]] %s2644_s1 }
   0x2   :  { %2661 = sst [smem:[#allocation20_spill]] %s2651_s8 }
   0x3   :  { %2662 = sst [smem:[#allocation21_spill]] %s2653_s10 }
   0x4   :  { %2663 = sst [smem:[#allocation22_spill]] %s2654_s11 }
   0x5   :  { %16 = vsyncpa [#allocation3], 0 }
   0x6   :  { %18 = vsyncpa [#allocation3 + $0x1], 0 }
   0x7   :  { %19 = vsyncpa [#allocation6], 0 }
   0x8   :  { %20 = vsyncpa [#allocation9], 0 }
   0x9   :  { %21 = vsyncpa [#allocation12], 0 }
   0xa   :  { %22 = vsyncpa [#allocation4], 0 }
   0xb   :  { %24 = vsyncpa [#allocation4 + $0x1], 0  ;;  %s2273_s17 = smov 0   ;;  %s2275_s18 = smov 0  }
   0xc   :  { %s2277_s19 = smov 0   ;;  %s2279_s20 = smov 0  }
   0xd LB: > { %s2200_s21 = smov [#allocation5]   ;;  %s2294_s23 = sadd.s32 4294967295, %s2198_s20   ;;  %s2198_s20 = sphi %s2279_s20, %s2694_s20   ;;  %s2194_s19 = sphi %s2277_s19, %s2693_s19   ;;  %s2190_s18 = sphi %s2275_s18, %s2692_s18   ;;  %s2186_s17 = sphi %s2273_s17, %s2691_s17  }
   0xe   : > { %s309_s22 = sshll.u32 %s2200_s21, 4  ;;  %p1541_p0 = scmp.ge.s32.totalorder %s2198_s20, 1  ;;  %s2299_s22 = int_to_ptr.vmem [resolvable:$true] %s309_s22 }
   0xf   : > { %p2656_p1 = scmp.eq.s32.totalorder %s2294_s23, 0  ;;  %p297_p2 = scmp.lt.s32.totalorder %s2198_s20, 3 }
  0x10   : > { %s2201_s25 = smov [#allocation8]   ;;  %s2202_s28 = smov [#allocation7]  }
  0x11   : > { %p2301_p3 = pnand %p1541_p0, %p297_p2  ;;  %s341_s26 = sshll.u32 %s2201_s25, 4  ;;  %s2314_s26 = int_to_ptr.vmem [resolvable:$true] %s341_s26 }
  0x12   : > { %s325_s29 = sshll.u32 %s2202_s28, 4  ;;  %s2666_s1 = sld [smem:[#allocation19_spill]]  ;;  %s2316_s29 = int_to_ptr.vmem [resolvable:$true] %s325_s29 }
  0x13   : > { %s2664_s24 = scalar_select %p2301_p3, 1, 0 }
  0x14   : > { %p1798_p5 = pneg %p2301_p3 }
  0x16   : > { %p2310_p6 = pnand %p1798_p5, %p2656_p1 }
  0x18   : > { %s1950_s13 = scalar_lea.hbm %s2666_s1, 2048  ;;  %p2326_p8 = pneg %p2310_p6 }
  0x19   : > { %p1951_p7 = scmp.ne.s32.totalorder %s2666_s1, %s1950_s13  ;;  %p1957_p11 = scmp.lt.u32.totalorder %s1950_s13, %s2666_s1 }
  0x1b   : > { %p1953_p9 = pnand %p2326_p8, %p1951_p7 }
  0x1d   : > { %p1954_p10 = pneg %p1953_p9 }
  0x1f   : > { %p1959_p12 = pnand %p1957_p11, %p1954_p10 }
  0x21   : > { %1962 = shalt.err (!%p1959_p12)
}
  0x22   : > { %s1963_s28 = scalar_lea.vmem %s2299_s22, 2048  ;;  %p1971_p5 = scmp.lt.s32.totalorder %s2299_s22, %s2299_s22 }
  0x23   : > { %p1964_p13 = scmp.ne.s32.totalorder %s2299_s22, %s1963_s28  ;;  %p1972_p4 = scmp.lt.s32.totalorder %s1963_s28, %s1963_s28 }
  0x25   : > { %p1966_p0 = pnand %p1964_p13, %p2326_p8  ;;  %p1973_p7 = por %p1972_p4, %p1971_p5 }
  0x27   : > { %p1967_p2 = pneg %p1966_p0 }
  0x29   : > { %p1974_p9 = pnand %p1973_p7, %p1967_p2 }
  0x2b   : > { %1977 = shalt.err (!%p1974_p9)
}
  0x2c   : > { %s2658_s30 = smov 64   ;;  %s2204_s12 = smov 4  }
  0x2d   : > { %1801 = dma.hbm_to_vmem [thread:$0]  (!%p2310_p6), %s2666_s1, 2048, %s2299_s22, [#allocation6], %s2658_s30, %s2658_s30, %s2204_s12  }
  0x2e   : > { %s1978_s25 = scalar_lea.hbm %s2648_s5, 1024 }
  0x2f   : > { %p1979_p4 = scmp.ne.s32.totalorder %s2648_s5, %s1978_s25  ;;  %p1985_p12 = scmp.lt.u32.totalorder %s1978_s25, %s2648_s5 }
  0x31   : > { %p1981_p10 = pnand %p1979_p4, %p2326_p8 }
  0x33   : > { %p1982_p11 = pneg %p1981_p10 }
  0x35   : > { %p1987_p13 = pnand %p1985_p12, %p1982_p11 }
  0x37   : > { %1990 = shalt.err (!%p1987_p13)
}
  0x38   : > { %s1991_s22 = scalar_lea.vmem %s2314_s26, 1024  ;;  %p1999_p7 = scmp.lt.s32.totalorder %s2314_s26, %s2314_s26 }
  0x39   : > { %p1992_p0 = scmp.ne.s32.totalorder %s2314_s26, %s1991_s22  ;;  %p2000_p9 = scmp.lt.s32.totalorder %s1991_s22, %s1991_s22 }
  0x3b   : > { %p1994_p2 = pnand %p1992_p0, %p2326_p8  ;;  %p2001_p4 = por %p2000_p9, %p1999_p7 }
  0x3d   : > { %p1995_p5 = pneg %p1994_p2 }
  0x3f   : > { %p2002_p10 = pnand %p2001_p4, %p1995_p5 }
  0x41   : > { %2005 = shalt.err (!%p2002_p10)
}
  0x42   : > { %1807 = dma.hbm_to_vmem [thread:$0]  (!%p2310_p6), %s2648_s5, 1024, %s2314_s26, [#allocation9], %s2658_s30, %s2658_s30, %s2204_s12  }
  0x43   : > { %s2006_s14 = scalar_lea.hbm %s2646_s3, 2048 }
  0x44   : > { %p2007_p11 = scmp.ne.s32.totalorder %s2646_s3, %s2006_s14  ;;  %p2013_p0 = scmp.lt.u32.totalorder %s2006_s14, %s2646_s3 }
  0x46   : > { %p2009_p12 = pnand %p2007_p11, %p2326_p8 }
  0x48   : > { %p2010_p13 = pneg %p2009_p12 }
  0x4a   : > { %p2015_p2 = pnand %p2013_p0, %p2010_p13 }
  0x4c   : > { %2018 = shalt.err (!%p2015_p2)
}
  0x4d   : > { %s2019_s26 = scalar_lea.vmem %s2316_s29, 2048  ;;  %p2027_p4 = scmp.lt.s32.totalorder %s2316_s29, %s2316_s29 }
  0x4e   : > { %p2020_p5 = scmp.ne.s32.totalorder %s2316_s29, %s2019_s26  ;;  %p2028_p10 = scmp.lt.s32.totalorder %s2019_s26, %s2019_s26 }
  0x50   : > { %p2022_p7 = pnand %p2020_p5, %p2326_p8  ;;  %p2029_p11 = por %p2028_p10, %p2027_p4 }
  0x52   : > { %p2023_p9 = pneg %p2022_p7 }
  0x54   : > { %p2030_p12 = pnand %p2029_p11, %p2023_p9 }
  0x56   : > { %2033 = shalt.err (!%p2030_p12)
}
  0x57   : > { %1804 = dma.hbm_to_vmem [thread:$0]  (!%p2310_p6), %s2646_s3, 2048, %s2316_s29, [#allocation6], %s2658_s30, %s2658_s30, %s2204_s12  }
  0x58   : > { %s2205_s10 = smov [#allocation10]   ;;  %s2206_s13 = smov [#allocation11]  }
  0x59   : > { %s357_s11 = sshll.u32 %s2205_s10, 4  ;;  %s373_s14 = sshll.u32 %s2206_s13, 4  ;;  %s358_s11 = int_to_ptr.vmem [resolvable:$true] %s357_s11  ;;  %s374_s14 = int_to_ptr.vmem [resolvable:$true] %s373_s14 }
  0x5a   : > { %s2034_s25 = scalar_lea.hbm %s2650_s7, 2048 }
  0x5b   : > { %p2035_p13 = scmp.ne.s32.totalorder %s2650_s7, %s2034_s25  ;;  %p2041_p5 = scmp.lt.u32.totalorder %s2034_s25, %s2650_s7 }
  0x5d   : > { %p2037_p0 = pnand %p2035_p13, %p2326_p8 }
  0x5f   : > { %p2038_p2 = pneg %p2037_p0 }
  0x61   : > { %p2043_p7 = pnand %p2041_p5, %p2038_p2 }
  0x63   : > { %2046 = shalt.err (!%p2043_p7)
}
  0x64   : > { %s2047_s29 = scalar_lea.vmem %s358_s11, 2048  ;;  %p2055_p11 = scmp.lt.s32.totalorder %s358_s11, %s358_s11 }
  0x65   : > { %p2048_p9 = scmp.ne.s32.totalorder %s358_s11, %s2047_s29  ;;  %p2056_p12 = scmp.lt.s32.totalorder %s2047_s29, %s2047_s29 }
  0x67   : > { %p2050_p4 = pnand %p2048_p9, %p2326_p8  ;;  %p2057_p1 = por %p2056_p12, %p2055_p11 }
  0x69   : > { %p2051_p10 = pneg %p2050_p4 }
  0x6b   : > { %p2058_p3 = pnand %p2057_p1, %p2051_p10 }
  0x6d   : > { %2061 = shalt.err (!%p2058_p3)
}
  0x6e   : > { %1810 = dma.hbm_to_vmem [thread:$0]  (!%p2310_p6), %s2650_s7, 2048, %s358_s11, [#allocation9], %s2658_s30, %s2658_s30, %s2204_s12  }
  0x6f   : > { %s2062_s15 = scalar_lea.hbm %s2652_s9, 2048 }
  0x70   : > { %p2063_p1 = scmp.ne.s32.totalorder %s2652_s9, %s2062_s15  ;;  %p2069_p0 = scmp.lt.u32.totalorder %s2062_s15, %s2652_s9 }
  0x72   : > { %p2065_p3 = pnand %p2063_p1, %p2326_p8 }
  0x74   : > { %p2066_p13 = pneg %p2065_p3 }
  0x76   : > { %p2071_p2 = pnand %p2069_p0, %p2066_p13 }
  0x78   : > { %2074 = shalt.err (!%p2071_p2)
}
  0x79   : > { %s2075_s22 = scalar_lea.vmem %s374_s14, 2048  ;;  %p2083_p4 = scmp.lt.s32.totalorder %s374_s14, %s374_s14 }
  0x7a   : > { %p2076_p5 = scmp.ne.s32.totalorder %s374_s14, %s2075_s22  ;;  %p2084_p10 = scmp.lt.s32.totalorder %s2075_s22, %s2075_s22 }
  0x7c   : > { %p2078_p7 = pnand %p2076_p5, %p2326_p8  ;;  %p2085_p11 = por %p2084_p10, %p2083_p4 }
  0x7e   : > { %p2079_p9 = pneg %p2078_p7 }
  0x80   : > { %p2086_p12 = pnand %p2085_p11, %p2079_p9 }
  0x82   : > { %2089 = shalt.err (!%p2086_p12)
}
  0x83   : > { %1813 = dma.hbm_to_vmem [thread:$0]  (!%p2310_p6), %s2652_s9, 2048, %s374_s14, [#allocation12], %s2658_s30, %s2658_s30, %s2204_s12  }
  0x84   : > { %s1540_s27 = sadd.s32 4294967294, %s2198_s20   ;;  %s2446_s16 = sadd.s32 1, %s2198_s20  }
  0x85   : > { %s37_s1 = sadd.s32 1, %s2194_s19  ;;  %s34_s8 = ssub.s32 %s2198_s20, %s2446_s16 }
  0x86   : > { %p44_p8 = scmp.ne.s32.totalorder %s2194_s19, %s2190_s18  ;;  %p35_p1 = scmp.eq.s32.totalorder %s34_s8, 0 }
  0x87   : > { %p45_p3 = scmp.eq.s32.totalorder %s2198_s20, 0  ;;  %p50_p13 = scmp.ne.s32.totalorder %s2190_s18, %s2186_s17 }
  0x88   : > { %p284_p0 = scmp.eq.s32.totalorder %s2294_s23, 1  ;;  %p2668_p5 = scmp.eq.s32.totalorder %s2294_s23, 0 }
  0x89   : > { %s2458_s10 = scalar_select %p35_p1, %s2194_s19, %s37_s1  }
  0x8a   : > { %p46_p2 = por %p45_p3, %p44_p8  ;;  %p2462_p7 = por %p2668_p5, %p50_p13 }
  0x8b   : > { %p2466_p6 = por %p284_p0, %p44_p8  ;;  %p290_p9 = scmp.eq.s32.totalorder %s1540_s27, 1 }
  0x8c   : > { %p1827_p4 = scmp.lt.s32.totalorder %s2198_s20, 2  ;;  %s390_s15 = sand.u32 1, %s2194_s19  }
  0x8d   : > { %s2670_s14 = scalar_select %p2466_p6, 1, 0 }
  0x8e   : > { %p2472_p10 = por %p290_p9, %p50_p13  ;;  %s1548_s25 = sshll.u32 %s390_s15, 3 }
  0x8f   : > { %s1648_s28 = sshll.u32 %s2198_s20, 7  ;;  %s394_s29 = scalar_lea.vmem [#allocation2], %s1548_s25 }
  0x90   : > { %s2671_s21 = scalar_select %p2472_p10, 1, 0 }
  0x91   : > { %s2480_s11 = scalar_lea.hbm %s2643_s0, %s1648_s28  ;;  %s401_s1 = sshll.u32 %s394_s29, 4  ;;  %s2486_s1 = int_to_ptr.vmem [resolvable:$true] %s401_s1 }
  0x92   : > { %p2482_p11 = pnand %p1827_p4, %p46_p2  ;;  %s2488_s8 = scalar_lea.sflag [#allocation3], %s390_s15 }
  0x93   : > { %s2090_s30 = scalar_lea.hbm %s2480_s11, 128  ;;  %s2095_s26 = scalar_lea.hbm %s2643_s0, 256 }
  0x94   : > { %p2091_p12 = scmp.ne.s32.totalorder %s2480_s11, %s2090_s30  ;;  %p2092_p8 = pneg %p2482_p11 }
  0x95   : > { %p2096_p13 = scmp.lt.u32.totalorder %s2480_s11, %s2643_s0  ;;  %p2097_p0 = scmp.lt.u32.totalorder %s2095_s26, %s2090_s30 }
  0x96   : > { %p2093_p1 = pnand %p2092_p8, %p2091_p12  ;;  %p2099_p5 = scmp.lt.u32.totalorder %s2090_s30, %s2480_s11 }
  0x97   : > { %p2098_p2 = por %p2097_p0, %p2096_p13 }
  0x98   : > { %p2094_p3 = pneg %p2093_p1 }
  0x99   : > { %p2100_p9 = por %p2099_p5, %p2098_p2 }
  0x9b   : > { %p2101_p4 = pnand %p2100_p9, %p2094_p3 }
  0x9d   : > { %2104 = shalt.err (!%p2101_p4)
}
  0x9e   : > { %s2105_s15 = scalar_lea.vmem %s2486_s1, 128  ;;  %s2207_s25 = smov [#allocation2]  }
  0x9f   : > { %p2106_p12 = scmp.ne.s32.totalorder %s2486_s1, %s2105_s15  ;;  %s2110_s28 = sshll.u32 %s2207_s25, 4  ;;  %s2111_s28 = int_to_ptr.vmem [resolvable:$false] %s2110_s28 }
  0xa0   : > { %s2112_s22 = scalar_lea.vmem %s2111_s28, 256  ;;  %p2113_p6 = scmp.lt.s32.totalorder %s2486_s1, %s2111_s28 }
  0xa1   : > { %p2108_p1 = pnand %p2106_p12, %p2092_p8  ;;  %p2114_p13 = scmp.lt.s32.totalorder %s2112_s22, %s2105_s15 }
  0xa3   : > { %p2109_p10 = pneg %p2108_p1  ;;  %p2115_p0 = por %p2114_p13, %p2113_p6 }
  0xa5   : > { %p2116_p2 = pnand %p2115_p0, %p2109_p10 }
  0xa7   : > { %2119 = shalt.err (!%p2116_p2)
}
  0xa8   : > { %s2673_s30 = smov 64   ;;  %p2674_p8 = scmp.ne.s32.totalorder %s2664_s24, 0 }
  0xa9   : > { %1817 = dma.hbm_to_vmem [thread:$0]  (!%p2482_p11), %s2480_s11, 128, %s2486_s1, %s2488_s8, %s2673_s30, %s2673_s30, %s2204_s12  }
  0xaa   : > { %413 = sbr.rel (%p2674_p8) target bundleno = 1165 (0x48d), region = 64  ;;  %s2522_s26 = sand.u32 (!%p2674_p8), 1, %s2190_s18  }
  0xab   : > { %s1552_s29 = sshll.u32 (!%p2674_p8), %s2522_s26, 3  ;;  %s416_s15 = scalar_lea.sflag (!%p2674_p8), [#allocation3], %s2522_s26 }
  0xac   : > { %s2528_s27 = scalar_lea.vmem (!%p2674_p8), [#allocation2], %s1552_s29 }
  0xb1   : > { %2165 = dma.done.wait (%p2462_p7), %s416_s15, 128  }
  0xb2   : > { %2167 = vsyncadd (%p2462_p7), %s416_s15, 4294967168  ;;  %p2675_p6 = scmp.eq.s32.totalorder %s2294_s23, 0 }
  0xb4   : > { %2169 = dma.done.wait (%p2675_p6), [#allocation6], 4096   ;;  %p2676_p10 = pmov %p2675_p6 }
  0xb5   : > { %p2677_p11 = pmov %p2675_p6 }
  0xb6   : > { %2171 = vsyncadd (%p2676_p10), [#allocation6], 4294963200 }
  0xb7   : > { %2173 = dma.done.wait (%p2677_p11), [#allocation9], 3072   ;;  %p2678_p3 = pmov %p2675_p6 }
  0xb9   : > { %2175 = vsyncadd (%p2678_p3), [#allocation9], 4294964224  ;;  %p2679_p5 = pmov %p2678_p3 }
  0xba   : > { %p2680_p9 = pmov %p2678_p3 }
  0xbb   : > { %2177 = dma.done.wait (%p2679_p5), [#allocation12], 2048  }
  0xbc   : > { %2179 = vsyncadd (%p2680_p9), [#allocation12], 4294965248  ;;  %v1877_v0 = vld [vmem:[#allocation5 + $0x40] sm:$0xff]   ;;  %v1879_v2 = vld [vmem:[#allocation5 + $0x48] sm:$0xff]   ;;  %vm495_vm0 = vsmask.f32 256 }
  0xbd   : > { %v1878_v1 = vld [vmem:[#allocation5] sm:$0xff]   ;;  %1657 = vmatprep.subr.bf16.mxu0 %v1877_v0  ;;  %v1880_v3 = vld [vmem:[#allocation5 + $0x8] sm:$0xff]   ;;  %v1881_v4 = vld [vmem:[#allocation5 + $0x50] sm:$0xff]   ;;  %vm494_vm1 = vcmask 1040384   ;;  %vm498_vm3 = vsmask.f32 7424 }
  0xbe   : > { %1658 = vmatpush3.bf16.msra.mxu0 %v1878_v1  ;;  %v1882_v5 = vld [vmem:[#allocation5 + $0x10] sm:$0xff]   ;;  %v1883_v6 = vld [vmem:[#allocation5 + $0x58] sm:$0xff]   ;;  %v1885_v8 = vld [vmem:[#allocation5 + $0x60] sm:$0xff]   ;;  %v2208_v34 = vmov 0.0   ;;  %vm2209_vm4 = vmmov 0   ;;  %vm1017_vm5 = vcmask 1046528  }
  0xbf   : > { %1659 = vmatprep.subr.bf16.mxu0 %v1879_v2  ;;  %v1884_v7 = vld [vmem:[#allocation5 + $0x18] sm:$0xff]   ;;  %v1886_v9 = vld [vmem:[#allocation5 + $0x20] sm:$0xff]   ;;  %v1887_v10 = vld [vmem:[#allocation5 + $0x68] sm:$0xff]   ;;  %s2685_s22 = sld [smem:[#allocation20_spill]]  ;;  %s1651_s24 = sshll.u32 %s2294_s23, 7 }
  0xc0   : > { %v2547_v11 = vld [vmem:[%s2528_s27] sm:$0xff]   ;;  %v1888_v12 = vld [vmem:[#allocation5 + $0x28] sm:$0xff]   ;;  %v1894_v13 = vld [vmem:[#allocation7 + $0x40] sm:$0xff]   ;;  %s2686_s27 = sld [smem:[#allocation21_spill]]  ;;  %s477_s12 = scalar_lea.vmem [#allocation13], %s1552_s29 }
  0xc1   : > { %v487_v14 = vshrl.u32 %v2547_v11, 16  ;;  %v490_v15 = vshll.u32 %v2547_v11, 16  ;;  %vm2552_vm2 = vmand %vm494_vm1, %vm495_vm0  ;;  %1679 = vmatprep.subr.bf16.mxu1 %v1894_v13  ;;  %v1895_v17 = vld [vmem:[#allocation7] sm:$0xff]   ;;  %v1889_v18 = vld [vmem:[#allocation5 + $0x70] sm:$0xff]   ;;  %s1419_s13 = sshll.u32 %s477_s12, 4  ;;  %s2687_s8 = sld [smem:[#allocation22_spill]]  ;;  %s2599_s13 = int_to_ptr.vmem [resolvable:$true] %s1419_s13 }
  0xc2   : > { %1660 = vmatpush3.bf16.msra.mxu0 %v1880_v3  ;;  %1680 = vmatpush3.bf16.msra.mxu1 %v1895_v17  ;;  %v1897_v20 = vld [vmem:[#allocation7 + $0x48] sm:$0xff]   ;;  %v1890_v21 = vld [vmem:[#allocation5 + $0x30] sm:$0xff]   ;;  %v1891_v24 = vld [vmem:[#allocation5 + $0x78] sm:$0xff]   ;;  %s1406_s28 = scalar_lea.sflag [#allocation4], %s2522_s26  ;;  %p2688_p4 = scmp.ne.s32.totalorder %s2670_s14, 0 }
  0xc3   : > { %1661 = vmatprep.subr.bf16.mxu0 %v1881_v4  ;;  %v489_v19 = vrot.slane %v487_v14, 7  ;;  %1681 = vmatprep.subr.bf16.mxu1 %v1897_v20  ;;  %v1892_v26 = vld [vmem:[#allocation5 + $0x38] sm:$0xff]   ;;  %v1896_v32 = vld [vmem:[#allocation8] sm:$0xff]   ;;  %v1898_v35 = vld [vmem:[#allocation7 + $0x8] sm:$0xff]   ;;  %s2210_s23 = smov [#allocation13]  }
  0xc4   : > { %v1899_v36 = vld [vmem:[#allocation8 + $0x8] sm:$0xff]   ;;  %v1900_v37 = vld [vmem:[#allocation7 + $0x50] sm:$0xff]   ;;  %v1903_v40 = vld [vmem:[#allocation7 + $0x58] sm:$0xff]   ;;  %s2124_s29 = sshll.u32 %s2210_s23, 4  ;;  %s2125_s29 = int_to_ptr.vmem [resolvable:$false] %s2124_s29 }
  0xc5   : > { %v492_v22 = vor.u32 %v490_v15, %v489_v19  ;;  %v507_v23 = vshll.u32 %v489_v19, 16  ;;  %v1901_v38 = vld [vmem:[#allocation7 + $0x10] sm:$0xff]   ;;  %v1904_v41 = vld [vmem:[#allocation7 + $0x18] sm:$0xff]   ;;  %v1906_v43 = vld [vmem:[#allocation7 + $0x60] sm:$0xff]   ;;  %s2126_s30 = scalar_lea.vmem %s2125_s29, 256  ;;  %p2127_p13 = scmp.lt.s32.totalorder %s2599_s13, %s2125_s29 }
  0xc6   : > { %1662 = vmatpush3.bf16.msra.mxu0 %v1882_v5  ;;  %1682 = vmatpush3.bf16.msra.mxu1 %v1898_v35  ;;  %v1902_v39 = vld [vmem:[#allocation8 + $0x10] sm:$0xff]   ;;  %v1905_v42 = vld [vmem:[#allocation8 + $0x18] sm:$0xff]   ;;  %v1907_v44 = vld [vmem:[#allocation7 + $0x20] sm:$0xff]  }
  0xc7   : > { %1663 = vmatprep.subr.bf16.mxu0 %v1883_v6  ;;  %v497_v25 = vsel %vm2552_vm2, 0, %v492_v22  ;;  %v509_v30 = vrot.slane %v507_v23, 1  ;;  %1683 = vmatprep.subr.bf16.mxu1 %v1900_v37  ;;  %v1908_v45 = vld [vmem:[#allocation8 + $0x20] sm:$0xff]   ;;  %v1909_v46 = vld [vmem:[#allocation7 + $0x68] sm:$0xff]   ;;  %v1912_v48 = vld [vmem:[#allocation7 + $0x70] sm:$0xff]   ;;  %s2597_s25 = scalar_lea.hbm %s2687_s8, %s1651_s24 }
  0xc8   : > { %v500_v27 = vshrl.u32 %v497_v25, 16  ;;  %v502_v28 = vshll.u32 %v497_v25, 16  ;;  %v1910_v47 = vld [vmem:[#allocation7 + $0x28] sm:$0xff]   ;;  %v1913_v50 = vld [vmem:[#allocation7 + $0x30] sm:$0xff]   ;;  %v1915_v51 = vld [vmem:[#allocation7 + $0x78] sm:$0xff]  }
  0xc9   : > { %v1911_v49 = vld [vmem:[#allocation8 + $0x28] sm:$0xff]   ;;  %v1914_v52 = vld [vmem:[#allocation8 + $0x30] sm:$0xff]   ;;  %v1916_v53 = vld [vmem:[#allocation7 + $0x38] sm:$0xff]  }
  0xca   : > { %1664 = vmatpush3.bf16.msra.mxu0 %v1884_v7  ;;  %v504_v29 = vrot.slane %v502_v28, 1  ;;  %1684 = vmatpush3.bf16.msra.mxu1 %v1901_v38  ;;  %v1917_v54 = vld [vmem:[#allocation8 + $0x38] sm:$0xff]   ;;  %v1918_v55 = vld [vmem:[#allocation10 + $0x40] sm:$0xff]   ;;  %v1560_v57 = vld [vmem:[%s2645_s2] ss:$0 sm:$0xff] }
  0xcb   : > { %1665 = vmatprep.subr.bf16.mxu0 %v1885_v8  ;;  %1685 = vmatprep.subr.bf16.mxu1 %v1903_v40  ;;  %v1919_v15 = vld [vmem:[#allocation10] sm:$0xff]   ;;  %v1921_v19 = vld [vmem:[#allocation10 + $0x8] sm:$0xff]   ;;  %v1922_v20 = vld [vmem:[#allocation10 + $0x50] sm:$0xff]  }
  0xcc   : > { %v505_v31 = vor.u32 %v504_v29, %v500_v27  ;;  %v1923_v16 = vld [vmem:[#allocation10 + $0x10] sm:$0xff]   ;;  %v1925_v23 = vld [vmem:[#allocation10 + $0x18] sm:$0xff]   ;;  %v1926_v27 = vld [vmem:[#allocation10 + $0x60] sm:$0xff]  }
  0xcd   : > { %v1927_v28 = vld [vmem:[#allocation10 + $0x20] sm:$0xff]   ;;  %v1928_v29 = vld [vmem:[#allocation10 + $0x68] sm:$0xff]   ;;  %v1939_v40 = vld [vmem:[#allocation11 + $0x10] sm:$0xff]  }
  0xce   : > { %1666 = vmatpush3.bf16.msra.mxu0 %v1886_v9  ;;  %v510_v33 = vsel %vm498_vm3, %v505_v31, %v509_v30  ;;  %1686 = vmatpush3.bf16.msra.mxu1 %v1904_v41  ;;  %v1929_v30 = vld [vmem:[#allocation10 + $0x28] sm:$0xff]   ;;  %v1930_v31 = vld [vmem:[#allocation10 + $0x70] sm:$0xff]   ;;  %v1934_v35 = vld [vmem:[#allocation11 + $0x40] sm:$0xff]  }
  0xcf   : > { %1667 = vmatprep.subr.bf16.mxu0 %v1887_v10  ;;  %679 = vmatprep.mubr.bf16.mxu0 %v510_v33  ;;  %v1932_v33 = vld [vmem:[#allocation10 + $0x78] sm:$0xff]   ;;  %v1936_v37 = vld [vmem:[#allocation11 + $0x48] sm:$0xff]   ;;  %vm2574_vm6 = vmneg %vm494_vm1 }
  0xd0   : > { %1687 = vmatprep.subr.bf16.mxu1 %v1906_v43  ;;  %v1937_v38 = vld [vmem:[#allocation11 + $0x8] sm:$0xff]   ;;  %v1940_v41 = vld [vmem:[#allocation11 + $0x58] sm:$0xff]   ;;  %v1577_v43 = vld [vmem:[%s2647_s4] ss:$0 sm:$0xff] }
  0xd2   : > { %1668 = vmatpush3.bf16.msra.mxu0 %v1888_v12  ;;  %1688 = vmatpush3.bf16.msra.mxu1 %v1907_v44 }
  0xd3   : > { %1669 = vmatprep.subr.bf16.mxu0 %v1889_v18  ;;  %1689 = vmatprep.subr.bf16.mxu1 %v1909_v46  ;;  %v1920_v18 = vld [vmem:[#allocation10 + $0x48] sm:$0xff]  }
  0xd6   : > { %1670 = vmatpush3.bf16.msra.mxu0 %v1890_v21  ;;  %1690 = vmatpush3.bf16.msra.mxu1 %v1910_v47  ;;  %v1924_v21 = vld [vmem:[#allocation10 + $0x58] sm:$0xff]  }
  0xd7   : > { %1671 = vmatprep.subr.bf16.mxu0 %v1891_v24  ;;  %1691 = vmatprep.subr.bf16.mxu1 %v1912_v48 }
  0xda   : > { %1672 = vmatpush3.bf16.msra.mxu0 %v1892_v26  ;;  %1692 = vmatpush3.bf16.msra.mxu1 %v1913_v50 }
  0xdb   : > { %1754 = vmatprep.subr.bf16.mxu0 %v2208_v34  ;;  %1693 = vmatprep.subr.bf16.mxu1 %v1915_v51 }
  0xdd   : > { %680 = vmatmul.mubr.bf16.vlgmr.msra.gmra.mrb[0].mxu0 %v497_v25 }
  0xde   : > { %1755 = vmatpush3.bf16.msra.mxu0 %v1896_v32  ;;  %1694 = vmatpush3.bf16.msra.mxu1 %v1916_v53  ;;  %v1931_v32 = vld [vmem:[#allocation10 + $0x30] sm:$0xff]  }
  0xdf   : > { %1756 = vmatprep.subr.bf16.mxu0 %v2208_v34  ;;  %1770 = vmatprep.mubr.msk.bf16.mxu0 %vm2209_vm4, %v2208_v34 }
  0xe0   : > { %1710 = vmatprep.subr.bf16.mxu1 %v1918_v55 }
  0xe2   : > { %1757 = vmatpush3.bf16.msra.mxu0 %v1899_v36  ;;  %v1935_v36 = vld [vmem:[#allocation11] sm:$0xff]  }
  0xe3   : > { %1758 = vmatprep.subr.bf16.mxu0 %v2208_v34 }
  0xe6   : > { %1759 = vmatpush3.bf16.msra.mxu0 %v1902_v39  ;;  %v1938_v39 = vld [vmem:[#allocation11 + $0x50] sm:$0xff]  }
  0xe7   : > { %1760 = vmatprep.subr.bf16.mxu0 %v2208_v34 }
  0xea   : > { %1761 = vmatpush3.bf16.msra.mxu0 %v1905_v42 }
  0xeb   : > { %1762 = vmatprep.subr.bf16.mxu0 %v2208_v34 }
  0xee   : > { %1763 = vmatpush3.bf16.msra.mxu0 %v1908_v45  ;;  %v1594_v45 = vld [vmem:[%s2649_s6] ss:$0 sm:$0xff] }
  0xef   : > { %1764 = vmatprep.subr.bf16.mxu0 %v2208_v34 }
  0xf2   : > { %1765 = vmatpush3.bf16.msra.mxu0 %v1911_v49 }
  0xf3   : > { %1766 = vmatprep.subr.bf16.mxu0 %v2208_v34 }
  0xf6   : > { %1767 = vmatpush3.bf16.msra.mxu0 %v1914_v52 }
  0xf7   : > { %1768 = vmatprep.subr.bf16.mxu0 %v2208_v34  ;;  %v1933_v34 = vld [vmem:[#allocation10 + $0x38] sm:$0xff]  }
  0xfa   : > { %1769 = vmatpush3.bf16.msra.mxu0 %v1917_v54 }
  0xfb   : > { %1732 = vmatprep.subr.bf16.mxu0 %v1934_v35 }
  0xfd   : > { %1771 = vmatmul.mubr.bf16.vlgmr.msra.gmra.mrb[4].mxu0 %v2547_v11 }
  0xfe   : > { %1733 = vmatpush3.bf16.msra.mxu0 %v1935_v36 }
  0xff   : > { %1734 = vmatprep.subr.bf16.mxu0 %v1936_v37 }
 0x102   : > { %1735 = vmatpush3.bf16.msra.mxu0 %v1937_v38 }
 0x103   : > { %1736 = vmatprep.subr.bf16.mxu0 %v1938_v39 }
 0x106   : > { %1737 = vmatpush3.bf16.msra.mxu0 %v1939_v40 }
 0x107   : > { %1738 = vmatprep.subr.bf16.mxu0 %v1940_v41 }
 0x1b0   : > { %v1673_v56 = vpop.f32.mrb[0].mxu0 }
 0x1b1   : > { %v1674_v58 = vpop.f32.mrb[1].mxu0 }
 0x1b2   : > { %v1675_v59 = vadd.f32 %v1674_v58, %v1673_v56  ;;  %v1676_v60 = vpop.f32.mrb[2].mxu0 }
 0x1b3   : > { %v1677_v61 = vpop.f32.mrb[3].mxu0 }
 0x1b4   : > { %v682_v62 = vadd.f32 %v1675_v59, %v1560_v57  ;;  %v1678_v63 = vadd.f32 %v1677_v61, %v1676_v60 }
 0x1b6   : > { %v685_v0 = vadd.f32 %v1678_v63, %v1560_v57  ;;  %v688_v1 = vmax.f32 %v682_v62, 0.0 }
 0x1b8   : > { %v689_v2 = vmax.f32 %v685_v0, 0.0 }
 0x1ba   : > { %v690_v3 = vpack.c.bf16 %v689_v2, %v688_v1 }
 0x1bc   : > { %v692_v4 = vshrl.u32 %v690_v3, 16  ;;  %v695_v5 = vshll.u32 %v690_v3, 16  ;;  %v1941_v3 = vld [vmem:[#allocation11 + $0x18] sm:$0xff]  }
 0x1bd   : > { %1739 = vmatpush3.bf16.msra.mxu0 %v1941_v3 }
 0x1be   : > { %v694_v6 = vrot.slane %v692_v4, 7  ;;  %v1942_v4 = vld [vmem:[#allocation11 + $0x60] sm:$0xff]  }
 0x1bf   : > { %1740 = vmatprep.subr.bf16.mxu0 %v1942_v4 }
 0x1c0   : > { %v697_v7 = vor.u32 %v695_v5, %v694_v6  ;;  %v708_v10 = vshll.u32 %v694_v6, 16  ;;  %v1943_v5 = vld [vmem:[#allocation11 + $0x20] sm:$0xff]   ;;  %v1944_v6 = vld [vmem:[#allocation11 + $0x68] sm:$0xff]  }
 0x1c1   : > { %1741 = vmatpush3.bf16.msra.mxu0 %v1943_v5 }
 0x1c2   : > { %v699_v8 = vsel %vm2552_vm2, 0, %v697_v7  ;;  %v710_v14 = vrot.slane %v708_v10, 1  ;;  %v1945_v7 = vld [vmem:[#allocation11 + $0x28] sm:$0xff]   ;;  %1742 = vmatprep.subr.bf16.mxu0 %v1944_v6  ;;  %v1948_v10 = vld [vmem:[#allocation11 + $0x78] sm:$0xff]  }
 0x1c3   : > { %v703_v9 = vshll.u32 %v699_v8, 16  ;;  %v701_v11 = vshrl.u32 %v699_v8, 16 }
 0x1c5   : > { %v705_v12 = vrot.slane %v703_v9, 1  ;;  %1743 = vmatpush3.bf16.msra.mxu0 %v1945_v7  ;;  %v1947_v9 = vld [vmem:[#allocation11 + $0x30] sm:$0xff]  }
 0x1c7   : > { %v706_v13 = vor.u32 %v705_v12, %v701_v11  ;;  %v1949_v11 = vld [vmem:[#allocation11 + $0x38] sm:$0xff]  }
 0x1c9   : > { %v711_v17 = vsel %vm498_vm3, %v706_v13, %v710_v14  ;;  %v1603_v13 = vld [vmem:[%s2685_s22] ss:$0 sm:$0xff]  ;;  %s2120_s22 = scalar_lea.vmem %s2599_s13, 128 }
 0x1ca   : > { %880 = vmatprep.mubr.bf16.mxu1 %v711_v17  ;;  %p2121_p7 = scmp.ne.s32.totalorder %s2599_s13, %s2120_s22  ;;  %p2128_p0 = scmp.lt.s32.totalorder %s2126_s30, %s2120_s22 }
 0x1cb   : > { %881 = vmatmul.mubr.bf16.vlgmr.msra.gmra.mrb[0].mxu1 %v699_v8  ;;  %v1946_v8 = vld [vmem:[#allocation11 + $0x70] sm:$0xff]  }
 0x1cc   : > { %1711 = vmatpush3.bf16.msra.mxu1 %v1919_v15  ;;  %1744 = vmatprep.subr.bf16.mxu0 %v1946_v8  ;;  %p2122_p12 = pnand %p2121_p7, %p2688_p4  ;;  %p2129_p2 = por %p2128_p0, %p2127_p13 }
 0x1cd   : > { %1712 = vmatprep.subr.bf16.mxu1 %v1920_v18  ;;  %1745 = vmatpush3.bf16.msra.mxu0 %v1947_v9 }
 0x1ce   : > { %1746 = vmatprep.subr.bf16.mxu0 %v1948_v10  ;;  %p2123_p1 = pneg %p2122_p12 }
 0x1d0   : > { %1713 = vmatpush3.bf16.msra.mxu1 %v1921_v19  ;;  %v997_v22 = vpop.f32.mrb[4].mxu0  ;;  %p2130_p8 = pnand %p2129_p2, %p2123_p1 }
 0x1d1   : > { %1714 = vmatprep.subr.bf16.mxu1 %v1922_v20  ;;  %v1772_v24 = vpop.f32.mrb[5].mxu0  ;;  %v998_v50 = vadd.f32 %v1594_v45, %v997_v22  ;;  %1747 = vmatpush3.bf16.msra.mxu0 %v1949_v11 }
 0x1d2   : > { %v1000_v25 = vpop.f32.mrb[6].mxu0 }
 0x1d3   : > { %v1773_v26 = vpop.f32.mrb[7].mxu0  ;;  %v1001_v56 = vadd.f32 %v1594_v45, %v1000_v25 }
 0x1d4   : > { %1715 = vmatpush3.bf16.msra.mxu1 %v1923_v16 }
 0x1d5   : > { %1716 = vmatprep.subr.bf16.mxu1 %v1924_v21 }
 0x1d8   : > { %1717 = vmatpush3.bf16.msra.mxu1 %v1925_v23 }
 0x1d9   : > { %1718 = vmatprep.subr.bf16.mxu1 %v1926_v27 }
 0x1dc   : > { %1719 = vmatpush3.bf16.msra.mxu1 %v1927_v28 }
 0x1dd   : > { %1720 = vmatprep.subr.bf16.mxu1 %v1928_v29 }
 0x1e0   : > { %1721 = vmatpush3.bf16.msra.mxu1 %v1929_v30  ;;  %v1622_v30 = vld [vmem:[%s2686_s27] ss:$0 sm:$0xff] }
 0x1e1   : > { %1722 = vmatprep.subr.bf16.mxu1 %v1930_v31 }
 0x1e4   : > { %1723 = vmatpush3.bf16.msra.mxu1 %v1931_v32 }
 0x1e5   : > { %1724 = vmatprep.subr.bf16.mxu1 %v1932_v33 }
 0x1e8   : > { %1725 = vmatpush3.bf16.msra.mxu1 %v1933_v34 }
 0x29e   : > { %v1695_v42 = vpop.f32.mrb[0].mxu1 }
 0x29f   : > { %v1696_v44 = vpop.f32.mrb[1].mxu1 }
 0x2a0   : > { %v1697_v46 = vadd.f32 %v1696_v44, %v1695_v42  ;;  %v1698_v47 = vpop.f32.mrb[2].mxu1 }
 0x2a1   : > { %v1699_v48 = vpop.f32.mrb[3].mxu1 }
 0x2a2   : > { %v883_v49 = vadd.f32 %v1697_v46, %v1577_v43  ;;  %v1700_v51 = vadd.f32 %v1699_v48, %v1698_v47 }
 0x2a4   : > { %v889_v52 = vmax.f32 %v883_v49, 0.0  ;;  %v886_v53 = vadd.f32 %v1700_v51, %v1577_v43 }
 0x2a6   : > { %v1004_v54 = vadd.f32 %v998_v50, %v889_v52  ;;  %v890_v55 = vmax.f32 %v886_v53, 0.0 }
 0x2a8   : > { %v1005_v57 = vadd.f32 %v1001_v56, %v890_v55  ;;  %v1006_v58 = vmax.f32 %v1004_v54, 0.0 }
 0x2aa   : > { %v1007_v59 = vmax.f32 %v1005_v57, 0.0 }
 0x2ac   : > { %v1008_v60 = vpack.c.bf16 %v1007_v59, %v1006_v58 }
 0x2ae   : > { %v1010_v61 = vrot.slane %v1008_v60, 7  ;;  %v1389_v38 = vunpack.c.l.bf16 %v1008_v60  ;;  %v1390_v42 = vunpack.c.h.bf16 %v1008_v60 }
 0x2b0   : > { %v1014_v62 = vsel %vm494_vm1, 0, %v1010_v61  ;;  %v1019_v63 = vrot.slane %v1010_v61, 1 }
 0x2b1   : > { %v1018_v0 = vrot.slane %v1014_v62, 1 }
 0x2b3   : > { %v1020_v2 = vsel %vm1017_vm5, %v1018_v0, %v1019_v63 }
 0x2b4   : > { %1189 = vmatprep.mubr.bf16.mxu1 %v1020_v2 }
 0x2b5   : > { %1621 = vmatmul.mubr.msk.bf16.vlgmr.msra.gmra.mrb[4].mxu1 %vm2574_vm6, %v1010_v61 }
 0x388   : > { %v1726_v12 = vpop.f32.mrb[4].mxu1 }
 0x389   : > { %v1727_v14 = vpop.f32.mrb[5].mxu1 }
 0x38a   : > { %v1728_v15 = vadd.f32 %v1727_v14, %v1726_v12  ;;  %v1729_v17 = vpop.f32.mrb[6].mxu1 }
 0x38b   : > { %v1730_v18 = vpop.f32.mrb[7].mxu1 }
 0x38c   : > { %v1192_v19 = vadd.f32 %v1728_v15, %v1603_v13  ;;  %v1731_v20 = vadd.f32 %v1730_v18, %v1729_v17 }
 0x38e   : > { %v1195_v16 = vadd.f32 %v1731_v20, %v1603_v13  ;;  %v1198_v21 = vmax.f32 %v1192_v19, 0.0 }
 0x390   : > { %v1199_v22 = vmax.f32 %v1195_v16, 0.0 }
 0x392   : > { %v1200_v23 = vpack.c.bf16 %v1199_v22, %v1198_v21 }
 0x394   : > { %v1202_v24 = vrot.slane %v1200_v23, 7 }
 0x396   : > { %v1204_v25 = vsel %vm494_vm1, 0, %v1202_v24  ;;  %v1208_v26 = vrot.slane %v1202_v24, 1 }
 0x397   : > { %v1207_v27 = vrot.slane %v1204_v25, 1 }
 0x399   : > { %v1209_v28 = vsel %vm1017_vm5, %v1207_v27, %v1208_v26 }
 0x39a   : > { %1378 = vmatprep.mubr.bf16.mxu0 %v1209_v28 }
 0x39b   : > { %1640 = vmatmul.mubr.msk.bf16.vlgmr.msra.gmra.mrb[8].mxu0 %vm2574_vm6, %v1202_v24 }
 0x46e   : > { %v1748_v29 = vpop.f32.mrb[8].mxu0 }
 0x46f   : > { %v1749_v31 = vpop.f32.mrb[9].mxu0 }
 0x470   : > { %v1750_v32 = vadd.f32 %v1749_v31, %v1748_v29  ;;  %v1751_v33 = vpop.f32.mrb[10].mxu0 }
 0x471   : > { %v1752_v34 = vpop.f32.mrb[11].mxu0 }
 0x472   : > { %v1381_v35 = vadd.f32 %v1750_v32, %v1622_v30  ;;  %v1753_v36 = vadd.f32 %v1752_v34, %v1751_v33 }
 0x474   : > { %v1387_v37 = vmax.f32 %v1381_v35, 0.0  ;;  %v1384_v39 = vadd.f32 %v1753_v36, %v1622_v30 }
 0x476   : > { %v1391_v40 = vadd.f32 %v1389_v38, %v1387_v37  ;;  %v1388_v41 = vmax.f32 %v1384_v39, 0.0 }
 0x478   : > { %v1392_v43 = vadd.f32 %v1390_v42, %v1388_v41  ;;  %v1393_v44 = vmax.f32 %v1391_v40, 0.0 }
 0x47a   : > { %v1394_v45 = vmax.f32 %v1392_v43, 0.0 }
 0x47c   : > { %v1655_v46 = vpack.c.bf16 %v1394_v45, %v1393_v44 }
 0x47e   : > { %1656 = vst [vmem:[%s477_s12] sm:$0xff] %v1655_v46  }
 0x47f   : > { %2133 = shalt.err (!%p2130_p8)
}
 0x480   : > { %s2134_s15 = scalar_lea.hbm %s2597_s25, 128  ;;  %s2138_s12 = scalar_lea.hbm %s2687_s8, 256 }
 0x481   : > { %p2135_p6 = scmp.ne.s32.totalorder %s2597_s25, %s2134_s15  ;;  %p2139_p3 = scmp.lt.u32.totalorder %s2597_s25, %s2687_s8 }
 0x482   : > { %p2140_p5 = scmp.lt.u32.totalorder %s2138_s12, %s2134_s15  ;;  %p2142_p7 = scmp.lt.u32.totalorder %s2134_s15, %s2597_s25 }
 0x483   : > { %p2136_p10 = pnand %p2135_p6, %p2688_p4 }
 0x484   : > { %p2141_p9 = por %p2140_p5, %p2139_p3 }
 0x485   : > { %p2137_p11 = pneg %p2136_p10 }
 0x486   : > { %p2143_p12 = por %p2142_p7, %p2141_p9 }
 0x488   : > { %p2144_p1 = pnand %p2143_p12, %p2137_p11 }
 0x48a   : > { %2147 = shalt.err (!%p2144_p1)
}
 0x48b   : > { %s2211_s22 = smov 64   ;;  %s2212_s23 = smov 4  }
 0x48c   : > { %1796 = dma.vmem_to_hbm [thread:$0]  (%p2688_p4), %s2599_s13, 128, %s2597_s25, %s1406_s28, %s2211_s22, %s2211_s22, %s2212_s23  }
 0x48d PF: > { %s1434_s29 = sand.u32 1, %s2186_s17   ;;  %p2689_p13 = scmp.ne.s32.totalorder %s2671_s21, 0 }
 0x48e   : > { %p2690_p0 = scmp.ge.s32.totalorder %s2198_s20, 2  ;;  %s1435_s30 = scalar_lea.sflag [#allocation4], %s1434_s29 }
 0x490   : > { %p1819_p2 = pnand %p2690_p0, %p2689_p13 }
 0x492   : > { %2181 = dma.done.wait (!%p1819_p2), %s1435_s30, 128  }
 0x493   : > { %2183 = vsyncadd (!%p1819_p2), %s1435_s30, 4294967168  ;;  %p27_p8 = scmp.ge.s32.totalorder %s2446_s16, 4   ;;  %s2691_s17 = smov %s2190_s18 }
 0x494   : > { %s2692_s18 = smov %s2194_s19  ;;  %s2693_s19 = smov %s2458_s10 }
 0x495   : > { %s2694_s20 = smov %s2446_s16  ;;  %29 = sbr.rel (!%p27_p8) target bundleno = 13 (0xd), region = 129 }
 0x49c   :  { %1440 = vsyncpa [#allocation3], 1 }
 0x49d   :  { %1442 = vsyncpa [#allocation3 + $0x1], 1 }
 0x49e   :  { %1443 = vsyncpa [#allocation6], 1 }
 0x49f   :  { %1444 = vsyncpa [#allocation9], 1 }
 0x4a0   :  { %1445 = vsyncpa [#allocation12], 1 }
 0x4a1   :  { %1446 = vsyncpa [#allocation4], 1 }
 0x4a2   :  { %1448 = vsyncpa [#allocation4 + $0x1], 1 }

</bundles_post_ra>
